<compile_context>
chip_gen: v7x
topology: tpu7x:2x2x1
jax: 0.10.0
libtpu: 0.0.40
codegen_flags: <defaults>
</compile_context>

<pallas_src>
import functools

import jax
import jax.numpy as jnp
from jax.experimental import pallas as pl
from jax.experimental.pallas import tpu as pltpu


def _round_up(x, m):
    return ((x + m - 1) // m) * m


def _patchify(img, patch_size):
    """einops 'b c (h p1) (w p2) -> b (h w) (p1 p2 c)' as reshape + transpose."""
    B, C, H, W = img.shape
    p = patch_size
    h, w = H // p, W // p
    x = img.reshape(B, C, h, p, w, p)          # b c h p1 w p2
    x = x.transpose(0, 2, 4, 3, 5, 1)          # b h w p1 p2 c
    return x.reshape(B, h * w, p * p * C)      # b (h w) (p1 p2 c)


def _padded_tile_bytes(rows, cols, itemsize):
    """VMEM footprint of a (rows, cols) tile incl. sublane + 128-lane padding."""
    sublane = max(8, 32 // itemsize)           # f32: 8, bf16: 16, int8: 32
    return _round_up(rows, sublane) * _round_up(cols, 128) * itemsize


def _vmem_cap_bytes():
    """~75% of physical VMEM (v7x: 64 MiB, v5e/v6e: 128 MiB); never below 32 MiB."""
    phys = 64 << 20
    try:
        cap = getattr(pltpu.get_tpu_info(), "vmem_capacity_bytes", None)
        if cap:
            phys = int(cap)
    except Exception:
        pass
    return max((phys * 3) // 4, 32 << 20)


def _embed_kernel(x_ref, w_ref, add_ref, o_ref):
    # x_ref:   (1, tm, patch_dim)  patch tile of one batch element
    # w_ref:   (patch_dim, dim_p)  patch-embedding weight, resident in VMEM (constant index)
    # add_ref: (tm, dim_p)         per-patch additive term: pos_embedding[1 + s] + linear bias
    # o_ref:   (1, tm, dim_p)
    acc = jnp.dot(x_ref[0], w_ref[...], preferred_element_type=jnp.float32)
    o_ref[0] = (acc + add_ref[...].astype(jnp.float32)).astype(o_ref.dtype)


@functools.partial(jax.jit, static_argnames=("patch_size", "tm_max", "matmul_dtype"))
def image_embedder_2d(img, w, b, cls_token, pos_embedding, *, patch_size,
                      tm_max=512, matmul_dtype=None):
    """img: (B, C, H, W). w: (patch_dim, dim) [= nn.Linear weight transposed], b: (dim,),
    cls_token: (1, 1, dim), pos_embedding: (1, num_patches + 1, dim)."""
    B, C, H, W = img.shape
    p = patch_size
    assert H % p == 0 and W % p == 0, "Image dimensions must be divisible by the patch size."
    num_patches = (H // p) * (W // p)
    patch_dim = C * p * p
    dim = w.shape[1]
    out_dtype = img.dtype

    # Patchify: pure layout plumbing (reshape + transpose) kept in the wrapper (see TODO above).
    patches = _patchify(img, p)                                  # (B, num_patches, patch_dim)
    w_in = w
    if matmul_dtype is not None:
        # bf16 operands hit the fast MXU path (v6e/v7x) and halve x/W HBM + VMEM traffic; the
        # cast fuses into the patchify transpose.  Accumulation stays f32 inside the kernel.
        patches = patches.astype(matmul_dtype)
        w_in = w_in.astype(matmul_dtype)

    # Keep the output lane axis a multiple of 128 (unmasked vst path); slice back at the end.
    dim_p = _round_up(dim, 128)
    if dim_p != dim:
        w_in = jnp.pad(w_in, ((0, 0), (0, dim_p - dim)))
        b_p = jnp.pad(b, (0, dim_p - dim))
        pos_p = jnp.pad(pos_embedding, ((0, 0), (0, 0), (0, dim_p - dim)))
    else:
        b_p, pos_p = b, pos_embedding

    # Per-patch additive term (f32): row s -> pos_embedding[s + 1] + linear bias.
    add = (pos_p[0, 1:num_patches + 1, :] + b_p[None, :]).astype(jnp.float32)   # (np, dim_p)

    # Token tile: as large as the VMEM budget allows (fewer, fatter grid steps).
    tm_max = max(8, (tm_max // 8) * 8)
    tm = max(8, min(tm_max, _round_up(num_patches, 8)))

    in_itm = jnp.dtype(w_in.dtype).itemsize
    out_itm = jnp.dtype(out_dtype).itemsize

    def vmem_need(tm_):
        # The pipeline double-buffers every operand (the constant-index weight/add are DMA'd
        # only once but still get two buffers; pipeline_mode=pl.Buffered(1) could halve them
        # on VMEM-tight v7x configurations).
        return 2 * (_padded_tile_bytes(tm_, patch_dim, in_itm)       # x tile
                    + _padded_tile_bytes(patch_dim, dim_p, in_itm)   # weight (resident)
                    + _padded_tile_bytes(tm_, dim_p, 4)              # add tile (f32)
                    + _padded_tile_bytes(tm_, dim_p, out_itm))       # out tile

    cap = _vmem_cap_bytes()
    while tm > 8 and vmem_need(tm) > cap:
        tm = max(8, ((tm // 2) // 8) * 8)
    n_tiles = pl.cdiv(num_patches, tm)
    vmem_limit = int(min(max(2 * vmem_need(tm), 32 << 20), cap))

    flops = 2 * B * num_patches * patch_dim * dim_p
    bytes_accessed = int(patches.size * in_itm + w_in.size * in_itm
                         + n_tiles * tm * dim_p * 4
                         + B * num_patches * dim_p * out_itm)

    # Grid = (token_tiles, batch): token-tile axis OUTER so `add` is re-used across the inner
    # batch axis.  Both axes are independent -> "parallel" (megacore sharding on v7x; the grid
    # has >= 2 parallel steps whenever B >= 2 or n_tiles >= 2).  The ragged last token tile is
    # handled by Pallas (masked writes; garbage reads only feed dropped rows).
    out = pl.pallas_call(
        _embed_kernel,
        out_shape=jax.ShapeDtypeStruct((B, num_patches, dim_p), out_dtype),
        grid_spec=pltpu.PrefetchScalarGridSpec(
            num_scalar_prefetch=0,
            grid=(n_tiles, B),
            in_specs=[
                pl.BlockSpec((1, tm, patch_dim), lambda j, bi: (bi, j, 0)),
                pl.BlockSpec((patch_dim, dim_p), lambda j, bi: (0, 0)),   # fetched once, resident
                pl.BlockSpec((tm, dim_p), lambda j, bi: (j, 0)),          # fetched once per tile
            ],
            out_specs=pl.BlockSpec((1, tm, dim_p), lambda j, bi: (bi, j, 0)),
        ),
        compiler_params=pltpu.CompilerParams(
            dimension_semantics=("parallel", "parallel"),
            vmem_limit_bytes=vmem_limit,
        ),
        cost_estimate=pl.CostEstimate(
            flops=flops, transcendentals=0, bytes_accessed=bytes_accessed),
    )(patches, w_in, add)

    # CLS row = cls_token + pos[0]; prepend it and (only if dim was padded) drop the pad lanes.
    # Dropout(p=0.0) is an identity and intentionally omitted.
    cls_row = jnp.broadcast_to(
        (cls_token[0, 0, :] + pos_embedding[0, 0, :]).astype(out_dtype), (B, 1, dim))
    return jnp.concatenate([cls_row, out[..., :dim]], axis=1)      # (B, num_patches + 1, dim)


if __name__ == "__main__":
    key = jax.random.PRNGKey(0)
    k_img, k_w, k_b, k_cls, k_pos = jax.random.split(key, 5)

    # Small, module-consistent shapes; dim=128 keeps the output lane axis dense.
    batch, channels, image_size, patch_size, dim = 2, 3, 32, 8, 128
    num_patches = (image_size // patch_size) ** 2        # 16 -> seq = 17
    patch_dim = channels * patch_size ** 2               # 192

    img = jax.random.normal(k_img, (batch, channels, image_size, image_size), jnp.float32)

    # nn.Linear(patch_dim, dim) defaults (uniform +/- 1/sqrt(fan_in)); stored as (in, out).
    bound = 1.0 / (patch_dim ** 0.5)
    w = jax.random.uniform(k_w, (patch_dim, dim), jnp.float32, -bound, bound)
    b = jax.random.uniform(k_b, (dim,), jnp.float32, -bound, bound)
    cls_token = jax.random.normal(k_cls, (1, 1, dim), jnp.float32)
    pos_embedding = jax.random.normal(k_pos, (1, num_patches + 1, dim), jnp.float32)

    # Pure-JAX reference replicating the PyTorch forward (dropout p=0.0 is identity).
    patches = _patchify(img, patch_size)
    ref = patches @ w + b
    ref = jnp.concatenate([jnp.broadcast_to(cls_token, (batch, 1, dim)), ref], axis=1)
    ref = ref + pos_embedding[:, :num_patches + 1]

    # f32 operands: exact-path check.
    out = image_embedder_2d(img, w, b, cls_token, pos_embedding, patch_size=patch_size)
    out = jax.block_until_ready(out)
    assert out.shape == (batch, num_patches + 1, dim)
    assert jnp.allclose(out, ref, atol=2e-5, rtol=2e-5)

    # bf16 matmul operands (fast MXU path on v6e/v7x, f32 accumulation): loose tolerance.
    out_bf16 = image_embedder_2d(img, w, b, cls_token, pos_embedding,
                                 patch_size=patch_size, matmul_dtype=jnp.bfloat16)
    out_bf16 = jax.block_until_ready(out_bf16)
    assert out_bf16.shape == (batch, num_patches + 1, dim)
    assert float(jnp.max(jnp.abs(out_bf16 - ref))) < 0.1

    print("KERNEL_OK")
</pallas_src>

<mosaic_0001>
module attributes {stable_mosaic.version = 11 : i64} {
  func.func @_embed_kernel(%arg0: i32, %arg1: i32, %arg2: memref<1x16x192xf32, #tpu.memory_space<vmem>>, %arg3: memref<192x128xf32, #tpu.memory_space<vmem>>, %arg4: memref<16x128xf32, #tpu.memory_space<vmem>>, %arg5: memref<1x16x128xf32, #tpu.memory_space<vmem>>) attributes {dimension_semantics = [#tpu.dimension_semantics<parallel>, #tpu.dimension_semantics<parallel>], iteration_bounds = array<i64: 1, 2>, scalar_prefetch = 0 : i64, scratch_operands = 0 : i64, tpu.core_type = #tpu.core_type<tc>, window_params = [{transform_indices = @transform_0, window_bounds = array<i64: 1, 16, 192>}, {pipeline_mode = #tpu.pipeline_mode<synchronous>, transform_indices = @transform_1, window_bounds = array<i64: 192, 128>}, {transform_indices = @transform_2, window_bounds = array<i64: 16, 128>}, {transform_indices = @transform_3, window_bounds = array<i64: 1, 16, 128>}]} {
    %c0 = arith.constant 0 : index
    %c0_0 = arith.constant 0 : index
    %c0_1 = arith.constant 0 : index
    %0 = vector.load %arg2[%c0, %c0_0, %c0_1] : memref<1x16x192xf32, #tpu.memory_space<vmem>>, vector<1x16x192xf32>
    %1 = vector.shape_cast %0 : vector<1x16x192xf32> to vector<16x192xf32>
    %c0_2 = arith.constant 0 : index
    %c0_3 = arith.constant 0 : index
    %2 = vector.load %arg3[%c0_2, %c0_3] : memref<192x128xf32, #tpu.memory_space<vmem>>, vector<192x128xf32>
    %cst = arith.constant dense<0.000000e+00> : vector<16x128xf32>
    %3 = tpu.matmul %1, %2, %cst {dimension_numbers = #tpu.dot_dimension_numbers<[1], [0], [0], [1], [0, 0, 1, 1], [], []>} : vector<16x192xf32>, vector<192x128xf32>, vector<16x128xf32> -> vector<16x128xf32>
    %c0_4 = arith.constant 0 : index
    %c0_5 = arith.constant 0 : index
    %4 = vector.load %arg4[%c0_4, %c0_5] : memref<16x128xf32, #tpu.memory_space<vmem>>, vector<16x128xf32>
    %5 = arith.addf %3, %4 : vector<16x128xf32>
    %c0_6 = arith.constant 0 : index
    %c0_7 = arith.constant 0 : index
    %c0_8 = arith.constant 0 : index
    %6 = vector.load %arg5[%c0_6, %c0_7, %c0_8] : memref<1x16x128xf32, #tpu.memory_space<vmem>>, vector<1x16x128xf32>
    %7 = vector.shape_cast %6 : vector<1x16x128xf32> to vector<16x128xf32>
    %8 = vector.shape_cast %5 : vector<16x128xf32> to vector<1x16x128xf32>
    tpu.vector_store %arg5[%c0_6, %c0_7, %c0_8], %8 {strides = array<i32>} : memref<1x16x128xf32, #tpu.memory_space<vmem>>, vector<1x16x128xf32>,
    return
  }
  func.func @transform_0(%arg0: i32, %arg1: i32) -> (i32, i32, i32) {
    %c0_i32 = arith.constant 0 : i32
    %c0_i32_0 = arith.constant 0 : i32
    return %arg1, %arg0, %c0_i32 : i32, i32, i32
  }
  func.func @transform_1(%arg0: i32, %arg1: i32) -> (i32, i32) {
    %c0_i32 = arith.constant 0 : i32
    %c0_i32_0 = arith.constant 0 : i32
    %c0_i32_1 = arith.constant 0 : i32
    return %c0_i32, %c0_i32_0 : i32, i32
  }
  func.func @transform_2(%arg0: i32, %arg1: i32) -> (i32, i32) {
    %c0_i32 = arith.constant 0 : i32
    %c0_i32_0 = arith.constant 0 : i32
    return %arg0, %c0_i32 : i32, i32
  }
  func.func @transform_3(%arg0: i32, %arg1: i32) -> (i32, i32, i32) {
    %c0_i32 = arith.constant 0 : i32
    %c0_i32_0 = arith.constant 0 : i32
    return %arg1, %arg0, %c0_i32 : i32, i32, i32
  }
}

</mosaic_0001>

<bundles_post_ra>
// kernel: image_embedder_2d.1
= control target key start
LH: loop header
LB: loop body
LE: loop exit
PB: predicated region body
PF: predicated region fallthrough
CT: control target
= control target key end

     0   :  { %s600_s12 = smov 0   ;;  %s602_s13 = smov 0   ;;  %s745_s0 = inlined_call_operand.vmem [shape: f32[2,16,192], index: 0, kind: input, shape index: {}]   ;;  %s746_s1 = inlined_call_operand.vmem [shape: f32[192,128], index: 1, kind: input, shape index: {}]   ;;  %s747_s2 = inlined_call_operand.vmem [shape: f32[16,128], index: 2, kind: input, shape index: {}]   ;;  %s748_s3 = inlined_call_operand.vmem [shape: f32[2,16,128], index: 3, kind: output, shape index: {}]  }
   0x1   :  { %s604_s14 = smov 0  }
   0x2 LB: > { %s22_s15 = sadd.s32 1, %s573_s13  ;;  %p459_p0 = scmp.ge.s32.totalorder %s577_s14, 1  ;;  %s577_s14 = sphi %s604_s14, %s13_s14   ;;  %s573_s13 = sphi %s602_s13, %s750_s13   ;;  %s569_s12 = sphi %s600_s12, %s749_s12  }
   0x3   : > { %p23_p1 = scmp.ge.s32.totalorder %s22_s15, 2  ;;  %p170_p2 = scmp.lt.s32.totalorder %s577_s14, 3 }
   0x5   : > { %s752_s15 = smov (%p23_p1, %s22_s15), 0  ;;  %p171_p3 = pnand %p459_p0, %p170_p2 }
   0x6   : > { %v239_v0 = vld [vmem:[%s746_s1] sm:$0xff] (!%p171_p3)  ;;  %v240_v1 = vld [vmem:[%s746_s1 + $0x8] sm:$0xff] (!%p171_p3)  ;;  %v241_v2 = vld [vmem:[%s746_s1 + $0x10] sm:$0xff] (!%p171_p3)  ;;  %p209_p4 = scmp.lt.s32.totalorder (!%p171_p3), %s569_s12, 1  ;;  %v579_v3 = vmov (!%p171_p3), 0.0|0.0   ;;  %vm265_vm0 = vcmask (!%p171_p3), 523264  }
   0x7   : > { %174 = sbr.rel (%p171_p3) target bundleno = 271 (0x10f), region = 32  ;;  %470 = vmatprep.subr.bf16.mxu0 (!%p171_p3), %v579_v3  ;;  %506 = vmatprep.subr.bf16.mxu1 (!%p171_p3), %v579_v3  ;;  %v471_v4 = vpack.c.bf16 (!%p171_p3), %v240_v1, %v239_v0  ;;  %v242_v5 = vld [vmem:[%s746_s1 + $0x18] sm:$0xff] (!%p171_p3)  ;;  %v243_v7 = vld [vmem:[%s746_s1 + $0x20] sm:$0xff] (!%p171_p3)  ;;  %v244_v8 = vld [vmem:[%s746_s1 + $0x28] sm:$0xff] (!%p171_p3) }
   0x8   : > { %v474_v6 = vpack.c.bf16 (!%p171_p3), %v242_v5, %v241_v2  ;;  %v477_v9 = vpack.c.bf16 (!%p171_p3), %v244_v8, %v243_v7  ;;  %v245_v10 = vld [vmem:[%s746_s1 + $0x30] sm:$0xff] (!%p171_p3)  ;;  %v246_v11 = vld [vmem:[%s746_s1 + $0x38] sm:$0xff] (!%p171_p3)  ;;  %v247_v15 = vld [vmem:[%s746_s1 + $0x40] sm:$0xff] (!%p171_p3) }
   0x9   : > { %472 = vmatpush1.bf16.msra.mxu0 (!%p171_p3), %v471_v4  ;;  %518 = vmatpush1.bf16.msra.mxu1 (!%p171_p3), %v471_v4  ;;  %v480_v14 = vpack.c.bf16 (!%p171_p3), %v246_v11, %v245_v10  ;;  %v248_v16 = vld [vmem:[%s746_s1 + $0x48] sm:$0xff] (!%p171_p3)  ;;  %v249_v18 = vld [vmem:[%s746_s1 + $0x50] sm:$0xff] (!%p171_p3)  ;;  %v250_v19 = vld [vmem:[%s746_s1 + $0x58] sm:$0xff] (!%p171_p3) }
   0xa   : > { %473 = vmatprep.subr.bf16.mxu0 (!%p171_p3), %v579_v3  ;;  %507 = vmatprep.subr.bf16.mxu1 (!%p171_p3), %v579_v3  ;;  %v483_v17 = vpack.c.bf16 (!%p171_p3), %v248_v16, %v247_v15  ;;  %v486_v20 = vpack.c.bf16 (!%p171_p3), %v250_v19, %v249_v18  ;;  %v251_v21 = vld [vmem:[%s746_s1 + $0x60] sm:$0xff] (!%p171_p3)  ;;  %v252_v22 = vld [vmem:[%s746_s1 + $0x68] sm:$0xff] (!%p171_p3)  ;;  %v253_v24 = vld [vmem:[%s746_s1 + $0x70] sm:$0xff] (!%p171_p3) }
   0xb   : > { %v489_v23 = vpack.c.bf16 (!%p171_p3), %v252_v22, %v251_v21  ;;  %v254_v25 = vld [vmem:[%s746_s1 + $0x78] sm:$0xff] (!%p171_p3)  ;;  %v255_v27 = vld [vmem:[%s746_s1 + $0x80] sm:$0xff] (!%p171_p3)  ;;  %v256_v28 = vld [vmem:[%s746_s1 + $0x88] sm:$0xff] (!%p171_p3) }
   0xc   : > { %v492_v26 = vpack.c.bf16 (!%p171_p3), %v254_v25, %v253_v24  ;;  %v495_v29 = vpack.c.bf16 (!%p171_p3), %v256_v28, %v255_v27  ;;  %v257_v30 = vld [vmem:[%s746_s1 + $0x90] sm:$0xff] (!%p171_p3)  ;;  %v258_v31 = vld [vmem:[%s746_s1 + $0x98] sm:$0xff] (!%p171_p3)  ;;  %v259_v33 = vld [vmem:[%s746_s1 + $0xa0] sm:$0xff] (!%p171_p3) }
   0xd   : > { %475 = vmatpush1.bf16.msra.mxu0 (!%p171_p3), %v474_v6  ;;  %519 = vmatpush1.bf16.msra.mxu1 (!%p171_p3), %v474_v6  ;;  %v498_v32 = vpack.c.bf16 (!%p171_p3), %v258_v31, %v257_v30  ;;  %v260_v34 = vld [vmem:[%s746_s1 + $0xa8] sm:$0xff] (!%p171_p3)  ;;  %v261_v36 = vld [vmem:[%s746_s1 + $0xb0] sm:$0xff] (!%p171_p3)  ;;  %v262_v37 = vld [vmem:[%s746_s1 + $0xb8] sm:$0xff] (!%p171_p3) }
   0xe   : > { %s754_s12 = smov (!%p209_p4, %s569_s12), 1  ;;  %476 = vmatprep.subr.bf16.mxu0 %v579_v3  ;;  %508 = vmatprep.subr.bf16.mxu1 %v579_v3  ;;  %v501_v35 = vpack.c.bf16 %v260_v34, %v259_v33  ;;  %v504_v38 = vpack.c.bf16 %v262_v37, %v261_v36  ;;  %v263_v41 = vld [vmem:[%s747_s2] sm:$0xff]  ;;  %v264_v42 = vld [vmem:[%s747_s2 + $0x8] sm:$0xff] }
   0xf   : > { %s468_s28 = sshll.u32 %s754_s12, 5  ;;  %s469_s23 = sshll.u32 %s754_s12, 4 }
  0x10   : > { %s646_s4 = scalar_lea.vmem %s745_s0, %s468_s28  ;;  %s233_s30 = scalar_lea.vmem %s748_s3, %s469_s23 }
  0x11   : > { %v236_v12 = vld [vmem:[%s646_s4 + $0x8] sm:$0xff]  ;;  %v238_v13 = vld [vmem:[%s646_s4 + $0x18] sm:$0xff]  ;;  %478 = vmatpush1.bf16.msra.mxu0 %v477_v9  ;;  %520 = vmatpush1.bf16.msra.mxu1 %v477_v9  ;;  %v235_v39 = vld [vmem:[%s646_s4] sm:$0xff] }
  0x12   : > { %464 = vmatprep.mubr.msk.f32.mxu0 %vm265_vm0, %v236_v12  ;;  %465 = vmatprep.mubr.msk.f32.mxu1 %vm265_vm0, %v238_v13  ;;  %v237_v40 = vld [vmem:[%s646_s4 + $0x10] sm:$0xff] }
  0x13   : > { %479 = vmatprep.subr.bf16.mxu0 %v579_v3  ;;  %509 = vmatprep.subr.bf16.mxu1 %v579_v3 }
  0x15   : > { %481 = vmatpush1.bf16.msra.mxu0 %v480_v14  ;;  %521 = vmatpush1.bf16.msra.mxu1 %v480_v14 }
  0x16   : > { %482 = vmatprep.subr.bf16.mxu0 %v579_v3  ;;  %510 = vmatprep.subr.bf16.mxu1 %v579_v3 }
  0x19   : > { %484 = vmatpush1.bf16.msra.mxu0 %v483_v17  ;;  %522 = vmatpush1.bf16.msra.mxu1 %v483_v17 }
  0x1a   : > { %485 = vmatprep.subr.bf16.mxu0 %v579_v3  ;;  %511 = vmatprep.subr.bf16.mxu1 %v579_v3 }
  0x1d   : > { %487 = vmatpush1.bf16.msra.mxu0 %v486_v20  ;;  %523 = vmatpush1.bf16.msra.mxu1 %v486_v20 }
  0x1e   : > { %488 = vmatprep.subr.bf16.mxu0 %v579_v3  ;;  %512 = vmatprep.subr.bf16.mxu1 %v579_v3 }
  0x21   : > { %490 = vmatpush1.bf16.msra.mxu0 %v489_v23  ;;  %524 = vmatpush1.bf16.msra.mxu1 %v489_v23 }
  0x22   : > { %491 = vmatprep.subr.bf16.mxu0 %v579_v3  ;;  %513 = vmatprep.subr.bf16.mxu1 %v579_v3 }
  0x25   : > { %493 = vmatpush1.bf16.msra.mxu0 %v492_v26  ;;  %525 = vmatpush1.bf16.msra.mxu1 %v492_v26 }
  0x26   : > { %494 = vmatprep.subr.bf16.mxu0 %v579_v3  ;;  %514 = vmatprep.subr.bf16.mxu1 %v579_v3 }
  0x29   : > { %496 = vmatpush1.bf16.msra.mxu0 %v495_v29  ;;  %526 = vmatpush1.bf16.msra.mxu1 %v495_v29 }
  0x2a   : > { %497 = vmatprep.subr.bf16.mxu0 %v579_v3  ;;  %515 = vmatprep.subr.bf16.mxu1 %v579_v3 }
  0x2d   : > { %499 = vmatpush1.bf16.msra.mxu0 %v498_v32  ;;  %527 = vmatpush1.bf16.msra.mxu1 %v498_v32 }
  0x2e   : > { %500 = vmatprep.subr.bf16.mxu0 %v579_v3  ;;  %516 = vmatprep.subr.bf16.mxu1 %v579_v3 }
  0x31   : > { %502 = vmatpush1.bf16.msra.mxu0 %v501_v35  ;;  %528 = vmatpush1.bf16.msra.mxu1 %v501_v35 }
  0x32   : > { %503 = vmatprep.subr.bf16.mxu0 %v579_v3  ;;  %517 = vmatprep.subr.bf16.mxu1 %v579_v3 }
  0x35   : > { %505 = vmatpush1.bf16.msra.mxu0 %v504_v38  ;;  %529 = vmatpush1.bf16.msra.mxu1 %v504_v38 }
  0x38   : > { %337 = vmatmul.mubr.f32.vlgmr.msra.gmra.mrb[0].mxu0 %v235_v39  ;;  %342 = vmatmul.mubr.f32.vlgmr.msra.gmra.mrb[0].mxu1 %v237_v40 }
 0x10b   : > { %v338_v43 = vpop.f32.mrb[0].mxu0  ;;  %v343_v44 = vpop.f32.mrb[0].mxu1 }
 0x10c   : > { %v339_v45 = vadd.f32 %v338_v43, %v263_v41  ;;  %v344_v46 = vadd.f32 %v343_v44, %v264_v42  ;;  %v340_v47 = vpop.f32.mrb[1].mxu0  ;;  %v345_v48 = vpop.f32.mrb[1].mxu1 }
 0x10e   : > { %347 = vst [vmem:[%s233_s30] sm:$0xff] %v339_v45  ;;  %348 = vst [vmem:[%s233_s30 + $0x8] sm:$0xff] %v344_v46 }
 0x10f PF: > { %s13_s14 = sadd.s32 1, %s577_s14   ;;  %s749_s12 = smov %s573_s13 }
 0x110   : > { %p10_p5 = scmp.ge.s32.totalorder %s13_s14, 4   ;;  %s750_s13 = smov %s752_s15 }
 0x112   :  { %12 = sbr.rel (!%p10_p5) target bundleno = 2 (0x2), region = 65 }

</bundles_post_ra>
